<compile_context>
chip_gen: v5e
topology: v5e:2x2
jax: 0.10.0
libtpu: 0.0.40
codegen_flags: <defaults>
</compile_context>

<pallas_src>
import functools

import jax
import jax.numpy as jnp
from jax.experimental import pallas as pl
from jax.experimental.pallas import tpu as pltpu


def _fcnet_fused_kernel(*refs, n_layers):
    """refs = (x_ref, w0_ref, b0_ref, w1_ref, b1_ref, ..., o_ref).

    Whole net in one kernel: activations live in vregs/VMEM between layers.
    Each layer is a single native bf16 MXU pass with f32 accumulation; the
    bias-add and tanh/sigmoid run in f32 on the VPU/EUP.
    """
    x_ref = refs[0]
    o_ref = refs[-1]
    h = x_ref[...].astype(jnp.float32)
    for i in range(n_layers):
        w = refs[1 + 2 * i][...]                       # bf16 [Din, Dout]
        b = refs[2 + 2 * i][...].astype(jnp.float32)   # [1, Dout]
        y = jnp.dot(h.astype(jnp.bfloat16), w,
                    preferred_element_type=jnp.float32) + b
        h = jax.nn.sigmoid(y) if i == n_layers - 1 else jnp.tanh(y)
    o_ref[...] = h.astype(o_ref.dtype)


def init_fcnet_params(key, dims):
    """Deterministic init mirroring nn.Linear + weight_norm(dim=None)."""
    params = []
    for i in range(len(dims) - 1):
        key, k1, k2 = jax.random.split(key, 3)
        in_dim, out_dim = dims[i], dims[i + 1]
        bound = 1.0 / float(in_dim) ** 0.5
        # v plays the role of weight_norm's `v` (PyTorch layout [out, in])
        v = jax.random.uniform(k1, (out_dim, in_dim), jnp.float32, -bound, bound)
        b = jax.random.uniform(k2, (out_dim,), jnp.float32, -bound, bound)
        # weight_norm with dim=None: g is a scalar, initialized to ||v||_F
        g = jnp.linalg.norm(v)
        params.append((v, g, b))
    return params


def prepare_fcnet_params(params):
    """Fold weight_norm + transpose once; cast weights/biases to bf16.

    Returns layers[i] = (w [Din, Dout] bf16, b [1, Dout] bf16).  No padding:
    full-array blocks are exempt from the (8,128) rule and at these sizes the
    kernel is DMA-bound, so fewer bytes beats lane-dense stores.
    """
    layers = []
    for (v, g, b) in params:
        w = ((g / jnp.linalg.norm(v)) * v).T          # effective weight, [in, out]
        layers.append((w.astype(jnp.bfloat16),
                       b.reshape(1, -1).astype(jnp.bfloat16)))
    return layers


def fcnet_forward(layers, x):
    """Pallas-backed fused FCNet forward (eval mode: dropout == identity)."""
    n_layers = len(layers)
    B, _ = x.shape
    Dout = layers[-1][0].shape[1]

    flat_inputs = [x]
    in_specs = [pl.BlockSpec(memory_space=pltpu.MemorySpace.VMEM)]
    total_bytes = x.size * x.dtype.itemsize + B * Dout * x.dtype.itemsize
    for (w, b) in layers:
        flat_inputs += [w, b]
        in_specs += [pl.BlockSpec(memory_space=pltpu.MemorySpace.VMEM),
                     pl.BlockSpec(memory_space=pltpu.MemorySpace.VMEM)]
        total_bytes += w.size * w.dtype.itemsize + b.size * b.dtype.itemsize

    # Guard the "hold every layer resident in VMEM" pattern against v7x's
    # smaller VMEM (64 MiB physical, 32 MiB default scoped).
    # TODO(synk): switch to per-layer K/N tiling (emit_pipeline) once hidden
    #             dims reach a few thousand and this assert trips.
    assert total_bytes < 32 * 1024 * 1024, (
        f"FCNet resident-weights footprint {total_bytes} B exceeds the v7x "
        "scoped-VMEM budget; tile the layers instead.")

    kernel = functools.partial(_fcnet_fused_kernel, n_layers=n_layers)
    return pl.pallas_call(
        kernel,
        out_shape=jax.ShapeDtypeStruct((B, Dout), x.dtype),
        in_specs=in_specs,
        out_specs=pl.BlockSpec(memory_space=pltpu.MemorySpace.VMEM),
    )(*flat_inputs)


def fcnet_forward_ref(params, x):
    """Pure-JAX f32 reference for correctness checking (unpadded, per-layer)."""
    n = len(params)
    for i, (v, g, b) in enumerate(params):
        w_eff = (g / jnp.linalg.norm(v)) * v
        y = x @ w_eff.T + b
        x = jax.nn.sigmoid(y) if i == n - 1 else jnp.tanh(y)
    return x


if __name__ == "__main__":
    key = jax.random.PRNGKey(0)
    dims = [32, 64, 16]          # FCNet(dims=[32, 64, 16])
    batch = 8

    kp, kx = jax.random.split(key)
    params = init_fcnet_params(kp, dims)
    prepared = prepare_fcnet_params(params)          # once, at load time
    x = jax.random.normal(kx, (batch, dims[0]), dtype=jnp.float32)

    out = jax.block_until_ready(fcnet_forward(prepared, x))
    ref = jax.block_until_ready(fcnet_forward_ref(params, x))

    assert out.shape == (batch, dims[-1]), out.shape
    # bf16 weights -> loosen tolerance vs the f32 reference (outputs are
    # tanh/sigmoid-bounded, so absolute tolerance is meaningful).
    assert jnp.allclose(out, ref, atol=2e-2, rtol=2e-2), "mismatch vs reference"

    print("KERNEL_OK")
</pallas_src>

<mosaic_0001>
module attributes {stable_mosaic.version = 11 : i64} {
  func.func @_fcnet_fused_kernel(%arg0: memref<8x32xf32, #tpu.memory_space<vmem>>, %arg1: memref<32x64xbf16, #tpu.memory_space<vmem>>, %arg2: memref<1x64xbf16, #tpu.memory_space<vmem>>, %arg3: memref<64x16xbf16, #tpu.memory_space<vmem>>, %arg4: memref<1x16xbf16, #tpu.memory_space<vmem>>, %arg5: memref<8x16xf32, #tpu.memory_space<vmem>>) attributes {dimension_semantics = [], scalar_prefetch = 0 : i64, scratch_operands = 0 : i64, tpu.core_type = #tpu.core_type<tc>} {
    %c0 = arith.constant 0 : index
    %c0_0 = arith.constant 0 : index
    %0 = vector.load %arg0[%c0, %c0_0] : memref<8x32xf32, #tpu.memory_space<vmem>>, vector<8x32xf32>
    %c0_1 = arith.constant 0 : index
    %c0_2 = arith.constant 0 : index
    %1 = vector.load %arg1[%c0_1, %c0_2] : memref<32x64xbf16, #tpu.memory_space<vmem>>, vector<32x64xbf16>
    %c0_3 = arith.constant 0 : index
    %c0_4 = arith.constant 0 : index
    %2 = vector.load %arg2[%c0_3, %c0_4] : memref<1x64xbf16, #tpu.memory_space<vmem>>, vector<1x64xbf16>
    %3 = arith.extf %2 : vector<1x64xbf16> to vector<1x64xf32>
    %4 = arith.truncf %0 : vector<8x32xf32> to vector<8x32xbf16>
    %cst = arith.constant dense<0.000000e+00> : vector<8x64xf32>
    %5 = tpu.matmul %4, %1, %cst {dimension_numbers = #tpu.dot_dimension_numbers<[1], [0], [0], [1], [0, 0, 1, 1], [], []>} : vector<8x32xbf16>, vector<32x64xbf16>, vector<8x64xf32> -> vector<8x64xf32>
    %6 = vector.broadcast %3 : vector<1x64xf32> to vector<8x64xf32>
    %7 = arith.addf %5, %6 : vector<8x64xf32>
    %8 = math.tanh %7 : vector<8x64xf32>
    %c0_5 = arith.constant 0 : index
    %c0_6 = arith.constant 0 : index
    %9 = vector.load %arg3[%c0_5, %c0_6] : memref<64x16xbf16, #tpu.memory_space<vmem>>, vector<64x16xbf16>
    %c0_7 = arith.constant 0 : index
    %c0_8 = arith.constant 0 : index
    %10 = vector.load %arg4[%c0_7, %c0_8] : memref<1x16xbf16, #tpu.memory_space<vmem>>, vector<1x16xbf16>
    %11 = arith.extf %10 : vector<1x16xbf16> to vector<1x16xf32>
    %12 = arith.truncf %8 : vector<8x64xf32> to vector<8x64xbf16>
    %cst_9 = arith.constant dense<0.000000e+00> : vector<8x16xf32>
    %13 = tpu.matmul %12, %9, %cst_9 {dimension_numbers = #tpu.dot_dimension_numbers<[1], [0], [0], [1], [0, 0, 1, 1], [], []>} : vector<8x64xbf16>, vector<64x16xbf16>, vector<8x16xf32> -> vector<8x16xf32>
    %14 = vector.broadcast %11 : vector<1x16xf32> to vector<8x16xf32>
    %15 = arith.addf %13, %14 : vector<8x16xf32>
    %16 = arith.negf %15 : vector<8x16xf32>
    %17 = math.exp %16 : vector<8x16xf32>
    %cst_10 = arith.constant 1.000000e+00 : f32
    %18 = vector.broadcast %cst_10 : f32 to vector<8x16xf32>
    %19 = arith.addf %18, %17 : vector<8x16xf32>
    %20 = arith.divf %18, %19 : vector<8x16xf32>
    %c0_11 = arith.constant 0 : index
    %c0_12 = arith.constant 0 : index
    %21 = vector.load %arg5[%c0_11, %c0_12] : memref<8x16xf32, #tpu.memory_space<vmem>>, vector<8x16xf32>
    tpu.vector_store %arg5[%c0_11, %c0_12], %20 {strides = array<i32>} : memref<8x16xf32, #tpu.memory_space<vmem>>, vector<8x16xf32>,
    return
  }
}

</mosaic_0001>

<bundles_post_ra>
// kernel: tpu_custom_call.1
= control target key start
LH: loop header
LB: loop body
LE: loop exit
PB: predicated region body
PF: predicated region fallthrough
CT: control target
= control target key end

     0   :  { %s278_s0 = inlined_call_operand.vmem [shape: f32[8,32], index: 0, kind: input, shape index: {}]   ;;  %s279_s1 = inlined_call_operand.vmem [shape: bf16[32,64], index: 1, kind: input, shape index: {}]   ;;  %s280_s2 = inlined_call_operand.vmem [shape: bf16[1,64], index: 2, kind: input, shape index: {}]   ;;  %s281_s3 = inlined_call_operand.vmem [shape: bf16[64,16], index: 3, kind: input, shape index: {}]   ;;  %s282_s4 = inlined_call_operand.vmem [shape: bf16[1,16], index: 4, kind: input, shape index: {}]   ;;  %s283_s5 = inlined_call_operand.hbm [shape: f32[8,16], index: 5, kind: output, shape index: {}]  }
   0x1   :  { %v179_v0 = vld [vmem:[%s279_s1 + $0x8] sm:$0xff]  ;;  %v183_v1 = vld [vmem:[%s281_s3 + $0x18] sm:$0xff] }
   0x2   :  { %10 = vsyncpa [#allocation3], 0  ;;  %53 = vmatpush.bf16.msra.mxu0 %v179_v0  ;;  %v178_v2 = vld [vmem:[%s279_s1] sm:$0xff]  ;;  %105 = vmatpush.bf16.msra.mxu1 %v183_v1  ;;  %vm43_vm0 = vcmask 261120   ;;  %v182_v5 = vld [vmem:[%s281_s3 + $0x10] sm:$0xff]  ;;  %vm97_vm1 = vcmask 523264  }
   0x3   :  { %v22_v3 = vld [vmem:[%s278_s0] sm:$0xff]  ;;  %v181_v6 = vld [vmem:[%s281_s3 + $0x8] sm:$0xff]  ;;  %s142_s10 = sshll.u32 %s283_s5, 4  ;;  %vm133_vm5 = vcmask 130048   ;;  %s143_s10 = int_to_ptr.hbm [resolvable:$true] %s142_s10 }
   0x4   :  { %v29_v4 = vpack.c.bf16 %v22_v3, %v22_v3  ;;  %v180_v7 = vld [vmem:[%s281_s3] sm:$0xff] }
   0x5   :  { %v27_v8 = vld [vmem:[%s280_s2] sm:$0x1]  ;;  %s217_s2 = smov [#allocation2]  }
   0x6   :  { %54 = vmatpush.bf16.msra.mxu0 %v178_v2  ;;  %106 = vmatpush.bf16.msra.mxu1 %v182_v5  ;;  %v28_v9 = vunpack.c.l.bf16 %v27_v8  ;;  %v69_v16 = vld [vmem:[%s282_s4] sm:$0x1]  ;;  %s140_s3 = sshll.u32 %s217_s2, 4  ;;  %s141_s3 = int_to_ptr.vmem [resolvable:$true] %s140_s3 }
   0x7   :  { %v70_v17 = vunpack.c.l.bf16 %v69_v16 }
   0x8   :  { %v30_v10 = vperm.slane %v28_v9, 0 }
   0x9   :  { %159 = vmatmul.msk.bf16.vlgmr.msra.gmra.mxu0 %vm43_vm0, %v29_v4  ;;  %v72_v18 = vperm.slane %v70_v17, 0 }
   0xa   :  { %107 = vmatpush.bf16.msra.mxu1 %v181_v6 }
   0xe   :  { %108 = vmatpush.bf16.msra.mxu1 %v180_v7 }
  0x86   :  { %v56_v11 = vpop.f32.mrf.mxu0 }
  0x87   :  { %v57_v12 = vadd.f32 %v56_v11, %v30_v10 }
  0x89   :  { %185 = vtanh.f32 %v57_v12 }
  0x8e   :  { %v58_v13 = vpop.f32.mrf.mxu0 }
  0x8f   :  { %v186_v14 = vpop.eup %185 }
  0x90   :  { %v71_v15 = vpack.c.bf16 %v186_v14, %v186_v14 }
  0x92   :  { %176 = vmatmul.msk.bf16.vlgmr.msra.gmra.mxu1 %vm97_vm1, %v71_v15 }
 0x10f   :  { %v110_v19 = vpop.f32.mrf.mxu1 }
 0x110   :  { %v111_v20 = vadd.f32 %v110_v19, %v72_v18 }
 0x112   :  { %v177_v21 = vmul.f32 -1.442695, %v111_v20 }
 0x114   :  { %187 = vpow2.f32 %v177_v21 }
 0x117   :  { %v112_v22 = vpop.f32.mrf.mxu1 }
 0x11a   :  { %v188_v23 = vpop.eup %187 }
 0x11b   :  { %v117_v24 = vadd.f32 1.0, %v188_v23 }
 0x11d   :  { %189 = vrcp.f32 %v117_v24  ;;  %v129_v28 = vand.u32 2147483648, %v117_v24  ;;  %v127_v30 = vand.u32 2147483647, %v117_v24  ;;  %vm123_vm3 = vweird.f32 %v117_v24 }
 0x11f   :  { %v130_v32 = vor.u32 1.1754944e-38, %v129_v28  ;;  %vm128_vm6 = vcmp.eq.f32.partialorder %v127_v30, 8.507059e+37 }
 0x123   :  { %v190_v25 = vpop.eup %189 }
 0x124   :  { %v119_v26 = vmul.f32 %v190_v25, %v117_v24  ;;  %vm124_vm2 = vweird.f32 %v190_v25 }
 0x125   :  { %vm125_vm4 = vmor %vm123_vm3, %vm124_vm2 }
 0x126   :  { %v120_v27 = vsub.f32 1.0, %v119_v26 }
 0x128   :  { %v121_v29 = vmul.f32 %v190_v25, %v120_v27 }
 0x12a   :  { %v122_v31 = vadd.f32 %v190_v25, %v121_v29 }
 0x12c   :  { %v126_v33 = vsel %vm125_vm4, %v190_v25, %v122_v31 }
 0x12d   :  { %v131_v34 = vsel %vm128_vm6, %v130_v32, %v126_v33 }
 0x12e   :  { %134 = vst.msk [vmem:[#allocation2] sm:$0xff] %vm133_vm5, %v131_v34 }
 0x12f   :  { %145 = dma.vmem_to_hbm [thread:$0]  %s141_s3, 128, %s143_s10, [#allocation3]  }
 0x130   :  { %215 = dma.done.wait [#allocation3], 128  }
 0x131   :  { %216 = vsyncadd [#allocation3], 4294967168 }
 0x132   :  { %150 = vsyncpa [#allocation3], 1 }

</bundles_post_ra>
